<compile_context>
chip_gen: v7x
topology: tpu7x:2x2x1
jax: 0.10.0
libtpu: 0.0.40
codegen_flags: <defaults>
</compile_context>

<pallas_src>
import math

import jax
import jax.numpy as jnp
import numpy as np
from jax.experimental import pallas as pl
from jax.experimental.pallas import tpu as pltpu

EPS = 1e-5  # nn.LayerNorm default


def _round_up(a, b):
    return -(-a // b) * b


def _cdiv(a, b):
    return -(-a // b)


def _tpu_hw():
    """Returns (tensorcores sharing the grid, physical VMEM bytes per core)."""
    kind = ""
    try:
        kind = jax.devices()[0].device_kind.lower()
    except Exception:
        pass
    if "v7" in kind:
        return 2, 64 << 20
    return 1, 128 << 20  # v5e / v6e / safe default


def final_expand_kernel(x_ref, wcat_ref, bcat_ref, sum_ref, bcast_ref,
                        gamma_ref, beta_ref, alpha_ref, o_ref):
    # x_ref:     (TM2, R*Cin)   R input tokens packed per row (matmul_dtype)
    # wcat_ref:  (R*Cin, 2*RKC) [block_diag(w2) | block_diag(w2) @ avg]
    # bcat_ref:  (1, 2*RKC) f32 [bias | bias averaged within each Cout group]
    # sum_ref:   (RKC, RK3)     group-sum matrix (1/Cout entries)
    # bcast_ref: (RK3, RKC)     0/1 group broadcast-back matrix
    # gamma/beta:(1, RKC) f32   LayerNorm affine, tiled
    # alpha_ref: (1,) f32 SMEM  PReLU slope
    # o_ref:     (TM2, RKC)     lane-dense output (RKC % 128 == 0)
    rkc = o_ref.shape[-1]

    # ConvTranspose3d + LayerNorm mean in ONE MXU matmul (f32 accumulation).
    z = jnp.dot(x_ref[...], wcat_ref[...], preferred_element_type=jnp.float32)
    z = z + bcat_ref[...]
    y = z[:, :rkc]        # conv output (+ bias)
    mean = z[:, rkc:]     # per-(token, spatial-slot) channel mean (replicated)

    # Two-pass variance: per-group E[(y-mean)^2] via a thin sum matmul, then
    # rsqrt (f32), then a 0/1 broadcast back to full lane width (both on MXU).
    yc = y - mean
    m2 = jnp.dot((yc * yc).astype(sum_ref.dtype), sum_ref[...],
                 preferred_element_type=jnp.float32)          # (TM2, RK3)
    inv_g = jax.lax.rsqrt(m2 + EPS)
    inv = jnp.dot(inv_g.astype(bcast_ref.dtype), bcast_ref[...],
                  preferred_element_type=jnp.float32)         # (TM2, RKC)

    yn = yc * inv * gamma_ref[...] + beta_ref[...]

    # PReLU (single learnable slope, scalar read from SMEM).
    a = alpha_ref[0]
    o_ref[...] = jnp.where(yn >= 0, yn, a * yn).astype(o_ref.dtype)


def final_expand3d(x, weight, bias, gamma, beta, alpha, up_scaling_factor, *,
                   matmul_dtype=jnp.bfloat16, out_dtype=jnp.float32,
                   output_layout="channel_first"):
    """x: (B, Cin, H, W, D) -> (B, Cout, H*k, W*k, D*k).

    matmul_dtype=bf16 (default) halves the x HBM traffic and MXU passes; LN /
    PReLU elementwise math stays f32.  out_dtype=bf16 halves the writeback,
    output_layout="expanded_last" returns (B, H, W, D, k, k, k, Cout) and
    skips the XLA pixel-shuffle transpose.
    """
    B, Cin, H, W, D = x.shape
    Cout = weight.shape[1]
    k = up_scaling_factor
    K3 = k * k * k
    KC = K3 * Cout
    N = B * H * W * D

    # ---- packing factor: lane-dense output rows AND lane-dense x rows ----
    R_out = 128 // math.gcd(KC, 128)       # makes R*KC a multiple of 128
    R_in = 128 // math.gcd(Cin, 128)       # makes R*Cin a multiple of 128
    R = (R_out * R_in) // math.gcd(R_out, R_in)
    if R > 64:                             # keep packing / padding overhead bounded
        R = R_out
    RKC = R * KC
    RK3 = R * K3
    RCin = R * Cin
    N2 = _cdiv(N, R)                       # packed rows needed

    mm_b = jnp.dtype(matmul_dtype).itemsize
    o_b = jnp.dtype(out_dtype).itemsize

    # ---- generation-aware tile size / grid / VMEM budget ----
    num_tc, vmem_cap = _tpu_hw()
    vmem_limit = int(min(vmem_cap * 3 // 4, 96 << 20))
    budget = int(vmem_limit * 0.8)
    resident = (RCin * 2 * RKC * mm_b          # w_cat (resident operand)
                + 2 * RKC * RK3 * mm_b         # sum_mat + bcast
                + 4 * RKC * 4)                 # b_cat + gamma + beta
    per_row = (2 * RCin * mm_b                 # double-buffered x tile
               + 2 * RKC * o_b                 # double-buffered output tile
               + 2 * RKC * 4                   # z (fused [y | mean])
               + 4 * RKC * 4)                  # yc / yc^2 / inv / yn temporaries
    tm2_max = max(128, min(2048, ((budget - resident) // per_row // 16) * 16))

    grid_m = max(1, _cdiv(N2, tm2_max))
    if num_tc > 1:
        min_steps = 2 * num_tc                 # >= 2 pipelined steps per core (v7x)
        if grid_m < min_steps and N2 >= min_steps * 16:
            grid_m = min_steps
    TM2 = _round_up(_cdiv(N2, grid_m), 16)
    grid_m = _cdiv(N2, TM2)
    N2_pad = grid_m * TM2
    N_pad = N2_pad * R

    # ---- fold parameters once in f32 (tiny, trace-time) ----
    # ConvTranspose3d with kernel==stride, padding=0 is exactly a per-token
    # matmul with w2 = transpose(W, (0,2,3,4,1)).reshape(Cin, K3*Cout).
    f32 = jnp.float32
    w2 = jnp.transpose(weight, (0, 2, 3, 4, 1)).reshape(Cin, KC).astype(f32)
    w_big = jnp.einsum('rs,ck->rcsk', jnp.eye(R, dtype=f32),
                       w2).reshape(RCin, RKC)            # block-diag, R copies
    group = jnp.arange(RKC) // Cout
    avg = (group[:, None] == group[None, :]).astype(f32) / Cout   # trace-time only
    sum_mat = ((group[:, None] == jnp.arange(RK3)[None, :]).astype(f32)
               / Cout).astype(matmul_dtype)               # (RKC, RK3)
    bcast = (jnp.arange(RK3)[:, None] == group[None, :]).astype(matmul_dtype)
    bias_t = jnp.tile(bias.astype(f32), RK3).reshape(1, RKC)
    gamma_t = jnp.tile(gamma.astype(f32), RK3).reshape(1, RKC)
    beta_t = jnp.tile(beta.astype(f32), RK3).reshape(1, RKC)
    # Fuse conv matmul and LN-mean matmul: [y | mean] = x2 @ [Wb | Wb@avg] + bcat.
    w_cat = jnp.concatenate([w_big, w_big @ avg], axis=1).astype(matmul_dtype)
    b_cat = jnp.concatenate([bias_t, bias_t @ avg], axis=1)
    alpha_a = jnp.reshape(alpha, (1,)).astype(f32)

    # ---- tokens-x-channels input: cast to bf16 FIRST, then transpose/pad ----
    x_tok = jnp.transpose(x.astype(matmul_dtype), (0, 2, 3, 4, 1)).reshape(N, Cin)
    if N_pad > N:
        # Zero pad (bf16 bytes); padded rows give finite LN stats and are dropped.
        x_tok = jnp.pad(x_tok, ((0, N_pad - N), (0, 0)))
    x2 = x_tok.reshape(N2_pad, RCin)        # row-major repack => free reshape

    y2 = pl.pallas_call(
        final_expand_kernel,
        out_shape=jax.ShapeDtypeStruct((N2_pad, RKC), out_dtype),
        grid_spec=pltpu.PrefetchScalarGridSpec(
            num_scalar_prefetch=0,
            grid=(grid_m,),
            in_specs=[
                pl.BlockSpec((TM2, RCin), lambda i: (i, 0)),
                pl.BlockSpec((RCin, 2 * RKC), lambda i: (0, 0)),
                pl.BlockSpec((1, 2 * RKC), lambda i: (0, 0)),
                pl.BlockSpec((RKC, RK3), lambda i: (0, 0)),
                pl.BlockSpec((RK3, RKC), lambda i: (0, 0)),
                pl.BlockSpec((1, RKC), lambda i: (0, 0)),
                pl.BlockSpec((1, RKC), lambda i: (0, 0)),
                pl.BlockSpec(memory_space=pltpu.MemorySpace.SMEM),
            ],
            out_specs=pl.BlockSpec((TM2, RKC), lambda i: (i, 0)),
        ),
        compiler_params=pltpu.CompilerParams(
            dimension_semantics=("parallel",),
            vmem_limit_bytes=vmem_limit),
    )(x2, w_cat, b_cat, sum_mat, bcast, gamma_t, beta_t, alpha_a)

    # ---- glue back to the PyTorch layout ----
    # (N2_pad, RKC) row-major == (N_pad, KC) row-major: free reshape, drop pad.
    y = y2.reshape(N_pad, KC)[:N].reshape(B, H, W, D, k, k, k, Cout)
    if output_layout == "expanded_last":
        return y
    # TODO(synk): the pixel-shuffle interleave below has no rectangular
    # BlockSpec equivalent; it stays one XLA transpose (HBM round trip).
    # Downstream consumers that accept (B,H,W,D,k,k,k,Cout) should pass
    # output_layout="expanded_last" to skip it.
    y = jnp.transpose(y, (0, 7, 1, 4, 2, 5, 3, 6)).reshape(
        B, Cout, H * k, W * k, D * k)
    return y


def reference_final_expand3d(x, weight, bias, gamma, beta, alpha, k):
    """Pure-JAX reference reproducing the PyTorch forward."""
    B, Cin, H, W, D = x.shape
    Cout = weight.shape[1]
    # ConvTranspose3d, kernel==stride, padding=0:
    y = jnp.einsum('bchwd,coijl->bohiwjdl', x, weight)
    y = y.reshape(B, Cout, H * k, W * k, D * k) + bias[None, :, None, None, None]
    # Norm(out_dim), channel_first=True -> LayerNorm over channel axis.
    yc = jnp.moveaxis(y, 1, -1)
    mean = jnp.mean(yc, axis=-1, keepdims=True)
    var = jnp.mean((yc - mean) ** 2, axis=-1, keepdims=True)
    yn = (yc - mean) / jnp.sqrt(var + EPS) * gamma + beta
    yn = jnp.moveaxis(yn, -1, 1)
    # PReLU (single parameter)
    return jnp.where(yn >= 0, yn, alpha * yn)


if __name__ == "__main__":
    # Small shapes consistent with the module: B,C,H,W,D input, up factor 2.
    B, Cin, H, W, D = 2, 32, 4, 4, 4
    Cout, up = 8, 2

    key = jax.random.PRNGKey(0)
    kx, kw, kb = jax.random.split(key, 3)
    x = jax.random.normal(kx, (B, Cin, H, W, D), dtype=jnp.float32)
    # ConvTranspose3d weight shape: (in_dim, out_dim, k, k, k)
    weight = 0.05 * jax.random.normal(kw, (Cin, Cout, up, up, up),
                                      dtype=jnp.float32)
    bias = 0.01 * jax.random.normal(kb, (Cout,), dtype=jnp.float32)
    gamma = jnp.ones((Cout,), dtype=jnp.float32)   # nn.LayerNorm default
    beta = jnp.zeros((Cout,), dtype=jnp.float32)   # nn.LayerNorm default
    alpha = jnp.float32(0.25)                      # nn.PReLU default

    # Accuracy path: f32 MXU operands, tight check against the f32 reference.
    out = jax.block_until_ready(
        final_expand3d(x, weight, bias, gamma, beta, alpha, up,
                       matmul_dtype=jnp.float32))
    ref = reference_final_expand3d(x, weight, bias, gamma, beta, alpha, up)
    np.testing.assert_allclose(np.asarray(out), np.asarray(ref),
                               rtol=1e-4, atol=1e-4)
    assert out.shape == (B, Cout, H * up, W * up, D * up)

    # Default fast path (bf16 MXU operands + bf16 HBM-facing x): compare
    # against a reference that sees the same operand rounding.
    out_bf = jax.block_until_ready(
        final_expand3d(x, weight, bias, gamma, beta, alpha, up))
    x_r = x.astype(jnp.bfloat16).astype(jnp.float32)
    w_r = weight.astype(jnp.bfloat16).astype(jnp.float32)
    ref_bf = reference_final_expand3d(x_r, w_r, bias, gamma, beta, alpha, up)
    np.testing.assert_allclose(np.asarray(out_bf), np.asarray(ref_bf),
                               rtol=3e-2, atol=3e-2)

    print("KERNEL_OK")
</pallas_src>

<mosaic_0001>
module attributes {stable_mosaic.version = 11 : i64} {
  func.func @final_expand_kernel(%arg0: i32, %arg1: memref<32x128xf32, #tpu.memory_space<vmem>>, %arg2: memref<128x512xf32, #tpu.memory_space<vmem>>, %arg3: memref<1x512xf32, #tpu.memory_space<vmem>>, %arg4: memref<256x32xf32, #tpu.memory_space<vmem>>, %arg5: memref<32x256xf32, #tpu.memory_space<vmem>>, %arg6: memref<1x256xf32, #tpu.memory_space<vmem>>, %arg7: memref<1x256xf32, #tpu.memory_space<vmem>>, %arg8: memref<1xf32, #tpu.memory_space<smem>>, %arg9: memref<32x256xf32, #tpu.memory_space<vmem>>) attributes {dimension_semantics = [#tpu.dimension_semantics<parallel>], iteration_bounds = array<i64: 1>, scalar_prefetch = 0 : i64, scratch_operands = 0 : i64, tpu.core_type = #tpu.core_type<tc>, window_params = [{transform_indices = @transform_0, window_bounds = array<i64: 32, 128>}, {pipeline_mode = #tpu.pipeline_mode<synchronous>, transform_indices = @transform_1, window_bounds = array<i64: 128, 512>}, {pipeline_mode = #tpu.pipeline_mode<synchronous>, transform_indices = @transform_2, window_bounds = array<i64: 1, 512>}, {pipeline_mode = #tpu.pipeline_mode<synchronous>, transform_indices = @transform_3, window_bounds = array<i64: 256, 32>}, {pipeline_mode = #tpu.pipeline_mode<synchronous>, transform_indices = @transform_4, window_bounds = array<i64: 32, 256>}, {pipeline_mode = #tpu.pipeline_mode<synchronous>, transform_indices = @transform_5, window_bounds = array<i64: 1, 256>}, {pipeline_mode = #tpu.pipeline_mode<synchronous>, transform_indices = @transform_6, window_bounds = array<i64: 1, 256>}, {transform_indices = @transform_7, window_bounds = array<i64: 1>}, {transform_indices = @transform_8, window_bounds = array<i64: 32, 256>}]} {
    %c0 = arith.constant 0 : index
    %c0_0 = arith.constant 0 : index
    %0 = vector.load %arg1[%c0, %c0_0] : memref<32x128xf32, #tpu.memory_space<vmem>>, vector<32x128xf32>
    %c0_1 = arith.constant 0 : index
    %c0_2 = arith.constant 0 : index
    %1 = vector.load %arg2[%c0_1, %c0_2] : memref<128x512xf32, #tpu.memory_space<vmem>>, vector<128x512xf32>
    %cst = arith.constant dense<0.000000e+00> : vector<32x512xf32>
    %2 = tpu.matmul %0, %1, %cst {dimension_numbers = #tpu.dot_dimension_numbers<[1], [0], [0], [1], [0, 0, 1, 1], [], []>} : vector<32x128xf32>, vector<128x512xf32>, vector<32x512xf32> -> vector<32x512xf32>
    %c0_3 = arith.constant 0 : index
    %c0_4 = arith.constant 0 : index
    %3 = vector.load %arg3[%c0_3, %c0_4] : memref<1x512xf32, #tpu.memory_space<vmem>>, vector<1x512xf32>
    %4 = vector.broadcast %3 : vector<1x512xf32> to vector<32x512xf32>
    %5 = arith.addf %2, %4 : vector<32x512xf32>
    %6 = vector.extract_strided_slice %5 {offsets = [0, 0], sizes = [32, 256], strides = [1, 1]} : vector<32x512xf32> to vector<32x256xf32>
    %7 = vector.extract_strided_slice %5 {offsets = [0, 256], sizes = [32, 256], strides = [1, 1]} : vector<32x512xf32> to vector<32x256xf32>
    %8 = arith.subf %6, %7 : vector<32x256xf32>
    %9 = arith.mulf %8, %8 : vector<32x256xf32>
    %c0_5 = arith.constant 0 : index
    %c0_6 = arith.constant 0 : index
    %10 = vector.load %arg4[%c0_5, %c0_6] : memref<256x32xf32, #tpu.memory_space<vmem>>, vector<256x32xf32>
    %cst_7 = arith.constant dense<0.000000e+00> : vector<32x32xf32>
    %11 = tpu.matmul %9, %10, %cst_7 {dimension_numbers = #tpu.dot_dimension_numbers<[1], [0], [0], [1], [0, 0, 1, 1], [], []>} : vector<32x256xf32>, vector<256x32xf32>, vector<32x32xf32> -> vector<32x32xf32>
    %cst_8 = arith.constant 9.99999974E-6 : f32
    %12 = vector.broadcast %cst_8 : f32 to vector<32x32xf32>
    %13 = arith.addf %11, %12 : vector<32x32xf32>
    %14 = math.rsqrt %13 : vector<32x32xf32>
    %c0_9 = arith.constant 0 : index
    %c0_10 = arith.constant 0 : index
    %15 = vector.load %arg5[%c0_9, %c0_10] : memref<32x256xf32, #tpu.memory_space<vmem>>, vector<32x256xf32>
    %cst_11 = arith.constant dense<0.000000e+00> : vector<32x256xf32>
    %16 = tpu.matmul %14, %15, %cst_11 {dimension_numbers = #tpu.dot_dimension_numbers<[1], [0], [0], [1], [0, 0, 1, 1], [], []>} : vector<32x32xf32>, vector<32x256xf32>, vector<32x256xf32> -> vector<32x256xf32>
    %17 = arith.mulf %8, %16 : vector<32x256xf32>
    %c0_12 = arith.constant 0 : index
    %c0_13 = arith.constant 0 : index
    %18 = vector.load %arg6[%c0_12, %c0_13] : memref<1x256xf32, #tpu.memory_space<vmem>>, vector<1x256xf32>
    %19 = vector.broadcast %18 : vector<1x256xf32> to vector<32x256xf32>
    %20 = arith.mulf %17, %19 : vector<32x256xf32>
    %c0_14 = arith.constant 0 : index
    %c0_15 = arith.constant 0 : index
    %21 = vector.load %arg7[%c0_14, %c0_15] : memref<1x256xf32, #tpu.memory_space<vmem>>, vector<1x256xf32>
    %22 = vector.broadcast %21 : vector<1x256xf32> to vector<32x256xf32>
    %23 = arith.addf %20, %22 : vector<32x256xf32>
    %c0_16 = arith.constant 0 : index
    %24 = memref.load %arg8[%c0_16] : memref<1xf32, #tpu.memory_space<smem>>
    %cst_17 = arith.constant 0.000000e+00 : f32
    %25 = vector.broadcast %cst_17 : f32 to vector<32x256xf32>
    %26 = arith.cmpf oge, %23, %25 : vector<32x256xf32>
    %27 = vector.broadcast %24 : f32 to vector<32x256xf32>
    %28 = arith.mulf %27, %23 : vector<32x256xf32>
    %29 = arith.select %26, %23, %28 : vector<32x256xi1>, vector<32x256xf32>
    %c0_18 = arith.constant 0 : index
    %c0_19 = arith.constant 0 : index
    %30 = vector.load %arg9[%c0_18, %c0_19] : memref<32x256xf32, #tpu.memory_space<vmem>>, vector<32x256xf32>
    tpu.vector_store %arg9[%c0_18, %c0_19], %29 {strides = array<i32>} : memref<32x256xf32, #tpu.memory_space<vmem>>, vector<32x256xf32>,
    return
  }
  func.func @transform_0(%arg0: i32) -> (i32, i32) {
    %c0_i32 = arith.constant 0 : i32
    %c0_i32_0 = arith.constant 0 : i32
    return %arg0, %c0_i32 : i32, i32
  }
  func.func @transform_1(%arg0: i32) -> (i32, i32) {
    %c0_i32 = arith.constant 0 : i32
    %c0_i32_0 = arith.constant 0 : i32
    %c0_i32_1 = arith.constant 0 : i32
    return %c0_i32, %c0_i32_0 : i32, i32
  }
  func.func @transform_2(%arg0: i32) -> (i32, i32) {
    %c0_i32 = arith.constant 0 : i32
    %c0_i32_0 = arith.constant 0 : i32
    %c0_i32_1 = arith.constant 0 : i32
    return %c0_i32, %c0_i32_0 : i32, i32
  }
  func.func @transform_3(%arg0: i32) -> (i32, i32) {
    %c0_i32 = arith.constant 0 : i32
    %c0_i32_0 = arith.constant 0 : i32
    %c0_i32_1 = arith.constant 0 : i32
    return %c0_i32, %c0_i32_0 : i32, i32
  }
  func.func @transform_4(%arg0: i32) -> (i32, i32) {
    %c0_i32 = arith.constant 0 : i32
    %c0_i32_0 = arith.constant 0 : i32
    %c0_i32_1 = arith.constant 0 : i32
    return %c0_i32, %c0_i32_0 : i32, i32
  }
  func.func @transform_5(%arg0: i32) -> (i32, i32) {
    %c0_i32 = arith.constant 0 : i32
    %c0_i32_0 = arith.constant 0 : i32
    %c0_i32_1 = arith.constant 0 : i32
    return %c0_i32, %c0_i32_0 : i32, i32
  }
  func.func @transform_6(%arg0: i32) -> (i32, i32) {
    %c0_i32 = arith.constant 0 : i32
    %c0_i32_0 = arith.constant 0 : i32
    %c0_i32_1 = arith.constant 0 : i32
    return %c0_i32, %c0_i32_0 : i32, i32
  }
  func.func @transform_7(%arg0: i32) -> i32 {
    %c0_i32 = arith.constant 0 : i32
    %c0_i32_0 = arith.constant 0 : i32
    return %c0_i32 : i32
  }
  func.func @transform_8(%arg0: i32) -> (i32, i32) {
    %c0_i32 = arith.constant 0 : i32
    %c0_i32_0 = arith.constant 0 : i32
    return %arg0, %c0_i32 : i32, i32
  }
}

</mosaic_0001>

<bundles_post_ra>
// kernel: tpu_custom_call.1
= control target key start
LH: loop header
LB: loop body
LE: loop exit
PB: predicated region body
PF: predicated region fallthrough
CT: control target
= control target key end

     0   :  { %14 = vsyncpa [#allocation4], 0  ;;  %s1331_s0 = inlined_call_operand.hbm [shape: f32[32,128], index: 0, kind: input, shape index: {}]   ;;  %s1332_s1 = inlined_call_operand.hbm [shape: f32[128,512], index: 1, kind: input, shape index: {}]   ;;  %s1333_s2 = inlined_call_operand.hbm [shape: f32[1,512], index: 2, kind: input, shape index: {}]   ;;  %s1334_s3 = inlined_call_operand.hbm [shape: f32[256,32], index: 3, kind: input, shape index: {}]   ;;  %s1335_s4 = inlined_call_operand.hbm [shape: f32[32,256], index: 4, kind: input, shape index: {}]   ;;  %s1336_s5 = inlined_call_operand.hbm [shape: f32[1,256], index: 5, kind: input, shape index: {}]   ;;  %s1337_s6 = inlined_call_operand.hbm [shape: f32[1,256], index: 6, kind: input, shape index: {}]   ;;  %s1338_s7 = inlined_call_operand.<no memory space> [shape: f32[1], index: 7, kind: input, shape index: {}]   ;;  %s1339_s8 = inlined_call_operand.hbm [shape: f32[32,256], index: 8, kind: output, shape index: {}]  }
   0x1   :  { %15 = vsyncpa [#allocation7], 0 }
   0x2   :  { %16 = vsyncpa [#allocation10], 0 }
   0x3   :  { %17 = vsyncpa [#allocation13], 0 }
   0x4   :  { %18 = vsyncpa [#allocation5], 0  ;;  %s1098_s27 = smov [#allocation6]   ;;  %s912_s9 = scalar_lea.hbm %s1332_s1, 8192 }
   0x5   :  { %s36_s28 = sshll.u32 %s1098_s27, 4  ;;  %p913_p0 = scmp.ne.s32.totalorder %s1332_s1, %s912_s9  ;;  %s37_s28 = int_to_ptr.vmem [resolvable:$true] %s36_s28 }
   0x6   :  { %p916_p1 = scmp.lt.u32.totalorder %s912_s9, %s1332_s1 }
   0x8   :  { %p918_p2 = pnand %p916_p1, %p913_p0 }
   0xa   :  { %921 = shalt.err (!%p918_p2)
}
   0xb   :  { %s922_s14 = scalar_lea.vmem %s37_s28, 8192  ;;  %p927_p4 = scmp.lt.s32.totalorder %s37_s28, %s37_s28 }
   0xc   :  { %p923_p3 = scmp.ne.s32.totalorder %s37_s28, %s922_s14  ;;  %p928_p5 = scmp.lt.s32.totalorder %s922_s14, %s922_s14 }
   0xe   :  { %p929_p6 = por %p928_p5, %p927_p4 }
  0x10   :  { %p930_p7 = pnand %p929_p6, %p923_p3 }
  0x12   :  { %933 = shalt.err (!%p930_p7)
}
  0x13   :  { %s1099_s15 = smov 512   ;;  %s1100_s16 = smov 32  }
  0x14   :  { %42 = dma.hbm_to_vmem [thread:$0]  %s1332_s1, 8192, %s37_s28, [#allocation7], %s1099_s15, %s1099_s15, %s1100_s16  }
  0x15   :  { %s1101_s19 = smov [#allocation9]   ;;  %s1102_s21 = smov [#allocation12]  }
  0x16   :  { %s58_s20 = sshll.u32 %s1101_s19, 4  ;;  %s83_s22 = sshll.u32 %s1102_s21, 4  ;;  %s59_s20 = int_to_ptr.vmem [resolvable:$true] %s58_s20  ;;  %s84_s22 = int_to_ptr.vmem [resolvable:$true] %s83_s22 }
  0x17   :  { %s934_s25 = scalar_lea.hbm %s1334_s3, 4096 }
  0x18   :  { %p935_p8 = scmp.ne.s32.totalorder %s1334_s3, %s934_s25  ;;  %p938_p9 = scmp.lt.u32.totalorder %s934_s25, %s1334_s3 }
  0x1a   :  { %p940_p10 = pnand %p938_p9, %p935_p8 }
  0x1c   :  { %943 = shalt.err (!%p940_p10)
}
  0x1d   :  { %s944_s1 = scalar_lea.vmem %s59_s20, 4096  ;;  %p949_p12 = scmp.lt.s32.totalorder %s59_s20, %s59_s20 }
  0x1e   :  { %p945_p11 = scmp.ne.s32.totalorder %s59_s20, %s944_s1  ;;  %p950_p13 = scmp.lt.s32.totalorder %s944_s1, %s944_s1 }
  0x20   :  { %p951_p0 = por %p950_p13, %p949_p12 }
  0x22   :  { %p952_p1 = pnand %p951_p0, %p945_p11 }
  0x24   :  { %955 = shalt.err (!%p952_p1)
}
  0x25   :  { %s1103_s28 = smov 128   ;;  %s1104_s9 = smov 8  }
  0x26   :  { %64 = dma.hbm_to_vmem [thread:$0]  %s1334_s3, 4096, %s59_s20, [#allocation10], %s1103_s28, %s1103_s28, %s1104_s9  }
  0x27   :  { %s956_s14 = scalar_lea.hbm %s1336_s5, 32 }
  0x28   :  { %p957_p2 = scmp.ne.s32.totalorder %s1336_s5, %s956_s14  ;;  %p960_p3 = scmp.lt.u32.totalorder %s956_s14, %s1336_s5 }
  0x2a   :  { %p962_p4 = pnand %p960_p3, %p957_p2 }
  0x2c   :  { %965 = shalt.err (!%p962_p4)
}
  0x2d   :  { %s966_s19 = scalar_lea.vmem %s84_s22, 32  ;;  %p971_p6 = scmp.lt.s32.totalorder %s84_s22, %s84_s22 }
  0x2e   :  { %p967_p5 = scmp.ne.s32.totalorder %s84_s22, %s966_s19  ;;  %p972_p7 = scmp.lt.s32.totalorder %s966_s19, %s966_s19 }
  0x30   :  { %p973_p8 = por %p972_p7, %p971_p6 }
  0x32   :  { %p974_p9 = pnand %p973_p8, %p967_p5 }
  0x34   :  { %977 = shalt.err (!%p974_p9)
}
  0x35   :  { %86 = dma.hbm_to_vmem [thread:$0]  %s1336_s5, 32, %s84_s22, [#allocation13]  }
  0x36   :  { %s1105_s21 = smov [#allocation3]   ;;  %s1106_s24 = smov [#allocation8]  }
  0x37   :  { %s24_s23 = sshll.u32 %s1105_s21, 4  ;;  %s49_s25 = sshll.u32 %s1106_s24, 4  ;;  %s25_s23 = int_to_ptr.vmem [resolvable:$true] %s24_s23  ;;  %s50_s25 = int_to_ptr.vmem [resolvable:$true] %s49_s25 }
  0x38   :  { %s978_s29 = scalar_lea.hbm %s1331_s0, 512 }
  0x39   :  { %p979_p10 = scmp.ne.s32.totalorder %s1331_s0, %s978_s29  ;;  %p982_p11 = scmp.lt.u32.totalorder %s978_s29, %s1331_s0 }
  0x3b   :  { %p984_p12 = pnand %p982_p11, %p979_p10 }
  0x3d   :  { %987 = shalt.err (!%p984_p12)
}
  0x3e   :  { %s988_s5 = scalar_lea.vmem %s25_s23, 512  ;;  %p993_p0 = scmp.lt.s32.totalorder %s25_s23, %s25_s23 }
  0x3f   :  { %p989_p13 = scmp.ne.s32.totalorder %s25_s23, %s988_s5  ;;  %p994_p1 = scmp.lt.s32.totalorder %s988_s5, %s988_s5 }
  0x41   :  { %p995_p2 = por %p994_p1, %p993_p0 }
  0x43   :  { %p996_p3 = pnand %p995_p2, %p989_p13 }
  0x45   :  { %999 = shalt.err (!%p996_p3)
}
  0x46   :  { %30 = dma.hbm_to_vmem [thread:$0]  %s1331_s0, 512, %s25_s23, [#allocation4], %s1103_s28, %s1103_s28, %s1104_s9  }
  0x47   :  { %s1000_s15 = scalar_lea.hbm %s1333_s2, 64 }
  0x48   :  { %p1001_p4 = scmp.ne.s32.totalorder %s1333_s2, %s1000_s15  ;;  %p1004_p5 = scmp.lt.u32.totalorder %s1000_s15, %s1333_s2 }
  0x4a   :  { %p1006_p6 = pnand %p1004_p5, %p1001_p4 }
  0x4c   :  { %1009 = shalt.err (!%p1006_p6)
}
  0x4d   :  { %s1010_s3 = scalar_lea.vmem %s50_s25, 64  ;;  %p1015_p8 = scmp.lt.s32.totalorder %s50_s25, %s50_s25 }
  0x4e   :  { %p1011_p7 = scmp.ne.s32.totalorder %s50_s25, %s1010_s3  ;;  %p1016_p9 = scmp.lt.s32.totalorder %s1010_s3, %s1010_s3 }
  0x50   :  { %p1017_p10 = por %p1016_p9, %p1015_p8 }
  0x52   :  { %p1018_p11 = pnand %p1017_p10, %p1011_p7 }
  0x54   :  { %1021 = shalt.err (!%p1018_p11)
}
  0x55   :  { %52 = dma.hbm_to_vmem [thread:$0]  %s1333_s2, 64, %s50_s25, [#allocation7]  }
  0x56   :  { %s1107_s9 = smov [#allocation11]   ;;  %s1022_s24 = scalar_lea.hbm %s1335_s4, 1024 }
  0x57   :  { %s70_s20 = sshll.u32 %s1107_s9, 4  ;;  %p1023_p12 = scmp.ne.s32.totalorder %s1335_s4, %s1022_s24  ;;  %s71_s20 = int_to_ptr.vmem [resolvable:$true] %s70_s20 }
  0x58   :  { %p1026_p13 = scmp.lt.u32.totalorder %s1022_s24, %s1335_s4 }
  0x5a   :  { %p1028_p0 = pnand %p1026_p13, %p1023_p12 }
  0x5c   :  { %1031 = shalt.err (!%p1028_p0)
}
  0x5d   :  { %s1032_s1 = scalar_lea.vmem %s71_s20, 1024  ;;  %p1037_p2 = scmp.lt.s32.totalorder %s71_s20, %s71_s20 }
  0x5e   :  { %p1033_p1 = scmp.ne.s32.totalorder %s71_s20, %s1032_s1  ;;  %p1038_p3 = scmp.lt.s32.totalorder %s1032_s1, %s1032_s1 }
  0x60   :  { %p1039_p4 = por %p1038_p3, %p1037_p2 }
  0x62   :  { %p1040_p5 = pnand %p1039_p4, %p1033_p1 }
  0x64   :  { %1043 = shalt.err (!%p1040_p5)
}
  0x65   :  { %s1108_s2 = smov 256   ;;  %s1109_s25 = smov 16  }
  0x66   :  { %76 = dma.hbm_to_vmem [thread:$0]  %s1335_s4, 1024, %s71_s20, [#allocation10], %s1108_s2, %s1108_s2, %s1109_s25  }
  0x67   :  { %s1110_s5 = smov [#allocation14]   ;;  %s1044_s14 = scalar_lea.hbm %s1337_s6, 32 }
  0x68   :  { %s93_s22 = sshll.u32 %s1110_s5, 4  ;;  %p1045_p6 = scmp.ne.s32.totalorder %s1337_s6, %s1044_s14  ;;  %s94_s22 = int_to_ptr.vmem [resolvable:$true] %s93_s22 }
  0x69   :  { %p1048_p7 = scmp.lt.u32.totalorder %s1044_s14, %s1337_s6 }
  0x6b   :  { %p1050_p8 = pnand %p1048_p7, %p1045_p6 }
  0x6d   :  { %1053 = shalt.err (!%p1050_p8)
}
  0x6e   :  { %s1054_s19 = scalar_lea.vmem %s94_s22, 32  ;;  %p1059_p10 = scmp.lt.s32.totalorder %s94_s22, %s94_s22 }
  0x6f   :  { %p1055_p9 = scmp.ne.s32.totalorder %s94_s22, %s1054_s19  ;;  %p1060_p11 = scmp.lt.s32.totalorder %s1054_s19, %s1054_s19 }
  0x71   :  { %p1061_p12 = por %p1060_p11, %p1059_p10 }
  0x73   :  { %p1062_p13 = pnand %p1061_p12, %p1055_p9 }
  0x75   :  { %1065 = shalt.err (!%p1062_p13)
}
  0x76   :  { %96 = dma.hbm_to_vmem [thread:$0]  %s1337_s6, 32, %s94_s22, [#allocation13]  }
  0x77   :  { %1088 = dma.done.wait [#allocation4], 512  }
  0x78   :  { %1089 = vsyncadd [#allocation4], 4294966784 }
  0x79   :  { %1090 = dma.done.wait [#allocation7], 8256  }
  0x7a   :  { %1091 = vsyncadd [#allocation7], 4294959040 }
  0x7b   :  { %1092 = dma.done.wait [#allocation10], 5120  }
  0x7c   :  { %1093 = vsyncadd [#allocation10], 4294962176 }
  0x7d   :  { %1094 = dma.done.wait [#allocation13], 64  }
  0x7e   :  { %1095 = vsyncadd [#allocation13], 4294967232  ;;  %v1111_v0 = vmov 0.0   ;;  %v125_v1 = vld [vmem:[#allocation6 + $0x8] sm:$0xff]  ;;  %v127_v3 = vld [vmem:[#allocation6 + $0x18] sm:$0xff]  ;;  %vm533_vm0 = vcmask 261120  }
  0x7f   :  { %274 = vmatprep.mubr.f32.mxu0 %v1111_v0  ;;  %363 = vmatprep.mubr.f32.mxu1 %v1111_v0  ;;  %v129_v2 = vld [vmem:[#allocation6 + $0x28] sm:$0xff]  ;;  %v131_v5 = vld [vmem:[#allocation6 + $0x38] sm:$0xff]  ;;  %v124_v6 = vld [vmem:[#allocation6] sm:$0xff] }
  0x80   :  { %v785_v4 = vpack.c.bf16 %v129_v2, %v125_v1  ;;  %v128_v7 = vld [vmem:[#allocation6 + $0x20] sm:$0xff]  ;;  %v817_v8 = vpack.c.bf16 %v131_v5, %v127_v3  ;;  %v126_v10 = vld [vmem:[#allocation6 + $0x10] sm:$0xff]  ;;  %v133_v12 = vld [vmem:[#allocation6 + $0x48] sm:$0xff] }
  0x81   :  { %v787_v9 = vpack.c.bf16 %v128_v7, %v124_v6  ;;  %v130_v11 = vld [vmem:[#allocation6 + $0x30] sm:$0xff]  ;;  %v137_v14 = vld [vmem:[#allocation6 + $0x68] sm:$0xff]  ;;  %v135_v15 = vld [vmem:[#allocation6 + $0x58] sm:$0xff] }
  0x82   :  { %786 = vmatprep.subr.bf16.mxu0 %v785_v4  ;;  %v819_v13 = vpack.c.bf16 %v130_v11, %v126_v10  ;;  %v139_v16 = vld [vmem:[#allocation6 + $0x78] sm:$0xff]  ;;  %818 = vmatprep.subr.bf16.mxu1 %v817_v8  ;;  %v789_v17 = vpack.c.bf16 %v137_v14, %v133_v12  ;;  %v132_v19 = vld [vmem:[#allocation6 + $0x40] sm:$0xff]  ;;  %v134_v21 = vld [vmem:[#allocation6 + $0x50] sm:$0xff] }
  0x83   :  { %788 = vmatpush1.bf16.msra.mxu0 %v787_v9  ;;  %v821_v18 = vpack.c.bf16 %v139_v16, %v135_v15  ;;  %v136_v20 = vld [vmem:[#allocation6 + $0x60] sm:$0xff]  ;;  %v138_v23 = vld [vmem:[#allocation6 + $0x70] sm:$0xff]  ;;  %v141_v24 = vld [vmem:[#allocation6 + $0x88] sm:$0xff] }
  0x84   :  { %820 = vmatpush1.bf16.msra.mxu1 %v819_v13  ;;  %v791_v22 = vpack.c.bf16 %v136_v20, %v132_v19  ;;  %v145_v25 = vld [vmem:[#allocation6 + $0xa8] sm:$0xff]  ;;  %790 = vmatprep.subr.bf16.mxu0 %v789_v17  ;;  %v823_v26 = vpack.c.bf16 %v138_v23, %v134_v21  ;;  %v143_v28 = vld [vmem:[#allocation6 + $0x98] sm:$0xff]  ;;  %v140_v30 = vld [vmem:[#allocation6 + $0x80] sm:$0xff] }
  0x85   :  { %822 = vmatprep.subr.bf16.mxu1 %v821_v18  ;;  %v793_v27 = vpack.c.bf16 %v145_v25, %v141_v24  ;;  %v147_v29 = vld [vmem:[#allocation6 + $0xb8] sm:$0xff]  ;;  %v144_v32 = vld [vmem:[#allocation6 + $0xa0] sm:$0xff]  ;;  %v142_v33 = vld [vmem:[#allocation6 + $0x90] sm:$0xff] }
  0x86   :  { %v825_v31 = vpack.c.bf16 %v147_v29, %v143_v28  ;;  %v146_v34 = vld [vmem:[#allocation6 + $0xb0] sm:$0xff]  ;;  %v795_v35 = vpack.c.bf16 %v144_v32, %v140_v30  ;;  %v149_v36 = vld [vmem:[#allocation6 + $0xc8] sm:$0xff]  ;;  %v151_v38 = vld [vmem:[#allocation6 + $0xd8] sm:$0xff] }
  0x87   :  { %792 = vmatpush1.bf16.msra.mxu0 %v791_v22  ;;  %v153_v37 = vld [vmem:[#allocation6 + $0xe8] sm:$0xff]  ;;  %v827_v39 = vpack.c.bf16 %v146_v34, %v142_v33  ;;  %v155_v41 = vld [vmem:[#allocation6 + $0xf8] sm:$0xff]  ;;  %v148_v42 = vld [vmem:[#allocation6 + $0xc0] sm:$0xff] }
  0x88   :  { %824 = vmatpush1.bf16.msra.mxu1 %v823_v26  ;;  %794 = vmatprep.subr.bf16.mxu0 %v793_v27  ;;  %v797_v40 = vpack.c.bf16 %v153_v37, %v149_v36  ;;  %v152_v43 = vld [vmem:[#allocation6 + $0xe0] sm:$0xff]  ;;  %v829_v44 = vpack.c.bf16 %v155_v41, %v151_v38  ;;  %v150_v45 = vld [vmem:[#allocation6 + $0xd0] sm:$0xff]  ;;  %v157_v47 = vld [vmem:[#allocation6 + $0x108] sm:$0xff] }
  0x89   :  { %826 = vmatprep.subr.bf16.mxu1 %v825_v31  ;;  %v154_v46 = vld [vmem:[#allocation6 + $0xf0] sm:$0xff]  ;;  %v161_v48 = vld [vmem:[#allocation6 + $0x128] sm:$0xff]  ;;  %v159_v49 = vld [vmem:[#allocation6 + $0x118] sm:$0xff]  ;;  %v799_v51 = vpack.c.bf16 %v152_v43, %v148_v42 }
  0x8a   :  { %v163_v50 = vld [vmem:[#allocation6 + $0x138] sm:$0xff]  ;;  %v831_v52 = vpack.c.bf16 %v154_v46, %v150_v45  ;;  %v801_v53 = vpack.c.bf16 %v161_v48, %v157_v47  ;;  %v156_v54 = vld [vmem:[#allocation6 + $0x100] sm:$0xff]  ;;  %v158_v56 = vld [vmem:[#allocation6 + $0x110] sm:$0xff] }
  0x8b   :  { %796 = vmatpush1.bf16.msra.mxu0 %v795_v35  ;;  %v160_v55 = vld [vmem:[#allocation6 + $0x120] sm:$0xff]  ;;  %v833_v57 = vpack.c.bf16 %v163_v50, %v159_v49  ;;  %v162_v58 = vld [vmem:[#allocation6 + $0x130] sm:$0xff]  ;;  %v165_v59 = vld [vmem:[#allocation6 + $0x148] sm:$0xff] }
  0x8c   :  { %828 = vmatpush1.bf16.msra.mxu1 %v827_v39  ;;  %798 = vmatprep.subr.bf16.mxu0 %v797_v40  ;;  %v169_v60 = vld [vmem:[#allocation6 + $0x168] sm:$0xff]  ;;  %v167_v61 = vld [vmem:[#allocation6 + $0x158] sm:$0xff]  ;;  %v803_v63 = vpack.c.bf16 %v160_v55, %v156_v54  ;;  %v835_v1 = vpack.c.bf16 %v162_v58, %v158_v56  ;;  %v164_v3 = vld [vmem:[#allocation6 + $0x140] sm:$0xff] }
  0x8d   :  { %830 = vmatprep.subr.bf16.mxu1 %v829_v44  ;;  %v171_v62 = vld [vmem:[#allocation6 + $0x178] sm:$0xff]  ;;  %v805_v2 = vpack.c.bf16 %v169_v60, %v165_v59  ;;  %v168_v4 = vld [vmem:[#allocation6 + $0x160] sm:$0xff]  ;;  %v166_v5 = vld [vmem:[#allocation6 + $0x150] sm:$0xff] }
  0x8e   :  { %v837_v6 = vpack.c.bf16 %v171_v62, %v167_v61  ;;  %v170_v7 = vld [vmem:[#allocation6 + $0x170] sm:$0xff]  ;;  %v173_v8 = vld [vmem:[#allocation6 + $0x188] sm:$0xff]  ;;  %v175_v10 = vld [vmem:[#allocation6 + $0x198] sm:$0xff]  ;;  %v807_v12 = vpack.c.bf16 %v168_v4, %v164_v3 }
  0x8f   :  { %800 = vmatpush1.bf16.msra.mxu0 %v799_v51  ;;  %v177_v9 = vld [vmem:[#allocation6 + $0x1a8] sm:$0xff]  ;;  %v179_v11 = vld [vmem:[#allocation6 + $0x1b8] sm:$0xff]  ;;  %v839_v13 = vpack.c.bf16 %v170_v7, %v166_v5  ;;  %v172_v15 = vld [vmem:[#allocation6 + $0x180] sm:$0xff] }
  0x90   :  { %832 = vmatpush1.bf16.msra.mxu1 %v831_v52  ;;  %802 = vmatprep.subr.bf16.mxu0 %v801_v53  ;;  %v809_v14 = vpack.c.bf16 %v177_v9, %v173_v8  ;;  %v176_v16 = vld [vmem:[#allocation6 + $0x1a0] sm:$0xff]  ;;  %v174_v17 = vld [vmem:[#allocation6 + $0x190] sm:$0xff]  ;;  %v841_v18 = vpack.c.bf16 %v179_v11, %v175_v10  ;;  %v181_v20 = vld [vmem:[#allocation6 + $0x1c8] sm:$0xff] }
  0x91   :  { %834 = vmatprep.subr.bf16.mxu1 %v833_v57  ;;  %v178_v19 = vld [vmem:[#allocation6 + $0x1b0] sm:$0xff]  ;;  %v185_v21 = vld [vmem:[#allocation6 + $0x1e8] sm:$0xff]  ;;  %v183_v22 = vld [vmem:[#allocation6 + $0x1d8] sm:$0xff]  ;;  %v811_v24 = vpack.c.bf16 %v176_v16, %v172_v15 }
  0x92   :  { %v187_v23 = vld [vmem:[#allocation6 + $0x1f8] sm:$0xff]  ;;  %v843_v25 = vpack.c.bf16 %v178_v19, %v174_v17  ;;  %v813_v26 = vpack.c.bf16 %v185_v21, %v181_v20  ;;  %v180_v27 = vld [vmem:[#allocation6 + $0x1c0] sm:$0xff]  ;;  %v182_v29 = vld [vmem:[#allocation6 + $0x1d0] sm:$0xff] }
  0x93   :  { %804 = vmatpush1.bf16.msra.mxu0 %v803_v63  ;;  %v184_v28 = vld [vmem:[#allocation6 + $0x1e0] sm:$0xff]  ;;  %v845_v30 = vpack.c.bf16 %v187_v23, %v183_v22  ;;  %v186_v31 = vld [vmem:[#allocation6 + $0x1f0] sm:$0xff]  ;;  %v121_v48 = vld [vmem:[#allocation3 + $0x8] sm:$0xff]  ;;  %v190_v23 = vlaneseq }
  0x94   :  { %836 = vmatpush1.bf16.msra.mxu1 %v835_v1  ;;  %806 = vmatprep.subr.bf16.mxu0 %v805_v2  ;;  %v420_v32 = vld [vmem:[#allocation9 + $0x80] sm:$0xff]  ;;  %v421_v33 = vld [vmem:[#allocation9 + $0x88] sm:$0xff]  ;;  %v815_v34 = vpack.c.bf16 %v184_v28, %v180_v27  ;;  %v847_v35 = vpack.c.bf16 %v186_v31, %v182_v29  ;;  %v422_v39 = vld [vmem:[#allocation9 + $0x90] sm:$0xff] }
  0x95   :  { %838 = vmatprep.subr.bf16.mxu1 %v837_v6  ;;  %v849_v36 = vpack.c.bf16 %v421_v33, %v420_v32  ;;  %v404_v37 = vld [vmem:[#allocation9] sm:$0xff]  ;;  %v405_v38 = vld [vmem:[#allocation9 + $0x8] sm:$0xff]  ;;  %v423_v40 = vld [vmem:[#allocation9 + $0x98] sm:$0xff] }
  0x96   :  { %v120_v41 = vld [vmem:[#allocation3] sm:$0xff]  ;;  %v851_v42 = vpack.c.bf16 %v405_v38, %v404_v37  ;;  %v853_v43 = vpack.c.bf16 %v423_v40, %v422_v39  ;;  %v406_v44 = vld [vmem:[#allocation9 + $0x10] sm:$0xff]  ;;  %v425_v47 = vld [vmem:[#allocation9 + $0xa8] sm:$0xff] }
  0x97   :  { %808 = vmatpush1.bf16.msra.mxu0 %v807_v12  ;;  %v407_v45 = vld [vmem:[#allocation9 + $0x18] sm:$0xff]  ;;  %v424_v46 = vld [vmem:[#allocation9 + $0xa0] sm:$0xff]  ;;  %v409_v52 = vld [vmem:[#allocation9 + $0x28] sm:$0xff] }
  0x98   :  { %840 = vmatpush1.bf16.msra.mxu1 %v839_v13  ;;  %810 = vmatprep.subr.bf16.mxu0 %v809_v14  ;;  %v855_v49 = vpack.c.bf16 %v407_v45, %v406_v44  ;;  %v857_v50 = vpack.c.bf16 %v425_v47, %v424_v46  ;;  %v408_v51 = vld [vmem:[#allocation9 + $0x20] sm:$0xff]  ;;  %v426_v53 = vld [vmem:[#allocation9 + $0xb0] sm:$0xff]  ;;  %v427_v54 = vld [vmem:[#allocation9 + $0xb8] sm:$0xff] }
  0x99   :  { %842 = vmatprep.subr.bf16.mxu1 %v841_v18  ;;  %v122_v55 = vld [vmem:[#allocation3 + $0x10] sm:$0xff]  ;;  %v859_v56 = vpack.c.bf16 %v409_v52, %v408_v51  ;;  %v861_v57 = vpack.c.bf16 %v427_v54, %v426_v53  ;;  %v411_v59 = vld [vmem:[#allocation9 + $0x38] sm:$0xff]  ;;  %v428_v60 = vld [vmem:[#allocation9 + $0xc0] sm:$0xff] }
  0x9a   :  { %v410_v58 = vld [vmem:[#allocation9 + $0x30] sm:$0xff]  ;;  %v429_v61 = vld [vmem:[#allocation9 + $0xc8] sm:$0xff]  ;;  %v412_v2 = vld [vmem:[#allocation9 + $0x40] sm:$0xff] }
  0x9b   :  { %812 = vmatpush1.bf16.msra.mxu0 %v811_v24  ;;  %v123_v62 = vld [vmem:[#allocation3 + $0x18] sm:$0xff]  ;;  %v863_v63 = vpack.c.bf16 %v411_v59, %v410_v58  ;;  %v865_v1 = vpack.c.bf16 %v429_v61, %v428_v60  ;;  %v413_v3 = vld [vmem:[#allocation9 + $0x48] sm:$0xff]  ;;  %v432_v11 = vld [vmem:[#allocation9 + $0xe0] sm:$0xff]  ;;  %v191_v24 = vshrl.u32 %v190_v23, 7 }
  0x9c   :  { %844 = vmatpush1.bf16.msra.mxu1 %v843_v25  ;;  %814 = vmatprep.subr.bf16.mxu0 %v813_v26  ;;  %v430_v4 = vld [vmem:[#allocation9 + $0xd0] sm:$0xff]  ;;  %v431_v5 = vld [vmem:[#allocation9 + $0xd8] sm:$0xff]  ;;  %v867_v6 = vpack.c.bf16 %v413_v3, %v412_v2  ;;  %v433_v12 = vld [vmem:[#allocation9 + $0xe8] sm:$0xff] }
  0x9d   :  { %846 = vmatprep.subr.bf16.mxu1 %v845_v30  ;;  %v869_v7 = vpack.c.bf16 %v431_v5, %v430_v4  ;;  %v414_v8 = vld [vmem:[#allocation9 + $0x50] sm:$0xff]  ;;  %v415_v9 = vld [vmem:[#allocation9 + $0x58] sm:$0xff]  ;;  %v873_v13 = vpack.c.bf16 %v433_v12, %v432_v11  ;;  %v416_v14 = vld [vmem:[#allocation9 + $0x60] sm:$0xff]  ;;  %v1260_v25 = vsub.s32 0, %v191_v24  ;;  %v200_v27 = vsub.s32 2, %v191_v24 }
  0x9e   :  { %v871_v10 = vpack.c.bf16 %v415_v9, %v414_v8  ;;  %v417_v15 = vld [vmem:[#allocation9 + $0x68] sm:$0xff]  ;;  %v434_v17 = vld [vmem:[#allocation9 + $0xf0] sm:$0xff]  ;;  %v435_v18 = vld [vmem:[#allocation9 + $0xf8] sm:$0xff]  ;;  %v1262_v28 = vsub.s32 1, %v191_v24  ;;  %v204_v29 = vsub.s32 3, %v191_v24 }
  0x9f   :  { %816 = vmatpush1.bf16.msra.mxu0 %v815_v34  ;;  %v875_v16 = vpack.c.bf16 %v417_v15, %v416_v14  ;;  %v877_v19 = vpack.c.bf16 %v435_v18, %v434_v17  ;;  %v418_v20 = vld [vmem:[#allocation9 + $0x70] sm:$0xff]  ;;  %v419_v21 = vld [vmem:[#allocation9 + $0x78] sm:$0xff] }
  0xa0   :  { %848 = vmatpush1.bf16.msra.mxu1 %v847_v35  ;;  %850 = vmatprep.subr.bf16.mxu0 %v849_v36  ;;  %v879_v22 = vpack.c.bf16 %v419_v21, %v418_v20  ;;  %v188_v26 = vld [vmem:[#allocation8] sm:$0xf]  ;;  %v527_v23 = vld [vmem:[#allocation11 + $0x10] sm:$0xff] }
  0xa1   :  { %v193_v30 = vrot.slane %v188_v26, %v1260_v25  ;;  %v201_v31 = vrot.slane %v188_v26, %v200_v27  ;;  %v197_v32 = vrot.slane %v188_v26, %v1262_v28  ;;  %v205_v33 = vrot.slane %v188_v26, %v204_v29  ;;  %v528_v20 = vld [vmem:[#allocation11 + $0x18] sm:$0xff]  ;;  %v530_v26 = vld [vmem:[#allocation11 + $0x28] sm:$0xff] }
  0xa2   :  { %275 = vmatmul.mubr.f32.vlgmr.msra.gmra.mrb[0].mxu0 %v120_v41  ;;  %v532_v27 = vld [vmem:[#allocation11 + $0x38] sm:$0xff] }
  0xa3   :  { %364 = vmatmul.mubr.f32.vlgmr.msra.gmra.mrb[0].mxu1 %v120_v41  ;;  %280 = vmatprep.mubr.f32.mxu0 %v1111_v0  ;;  %v885_v29 = vpack.c.bf16 %v532_v27, %v530_v26 }
  0xa4   :  { %369 = vmatprep.mubr.f32.mxu1 %v1111_v0  ;;  %852 = vmatpush3.bf16.msra.mxu0 %v851_v42 }
  0xa5   :  { %854 = vmatprep.subr.bf16.mxu0 %v853_v43 }
  0xa6   :  { %281 = vmatmul.mubr.f32.gmra.mrb[2].mxu0 %v121_v48 }
  0xa7   :  { %370 = vmatmul.mubr.f32.gmra.mrb[2].mxu1 %v121_v48  ;;  %286 = vmatprep.mubr.f32.mxu0 %v1111_v0 }
  0xa8   :  { %375 = vmatprep.mubr.f32.mxu1 %v1111_v0  ;;  %856 = vmatpush3.bf16.msra.mxu0 %v855_v49 }
  0xa9   :  { %858 = vmatprep.subr.bf16.mxu0 %v857_v50 }
  0xaa   :  { %287 = vmatmul.mubr.f32.gmra.mrb[4].mxu0 %v122_v55 }
  0xab   :  { %376 = vmatmul.mubr.f32.gmra.mrb[4].mxu1 %v122_v55  ;;  %292 = vmatprep.mubr.f32.mxu0 %v1111_v0 }
  0xac   :  { %381 = vmatprep.mubr.f32.mxu1 %v1111_v0  ;;  %860 = vmatpush3.bf16.msra.mxu0 %v859_v56 }
  0xad   :  { %862 = vmatprep.subr.bf16.mxu0 %v861_v57 }
  0xae   :  { %293 = vmatmul.mubr.f32.gmra.mrb[6].mxu0 %v123_v62 }
  0xaf   :  { %382 = vmatmul.mubr.f32.gmra.mrb[6].mxu1 %v123_v62 }
  0xb0   :  { %864 = vmatpush3.bf16.msra.mxu0 %v863_v63  ;;  %610 = vmatprep.mubr.f32.mxu1 %v1111_v0 }
  0xb1   :  { %866 = vmatprep.subr.bf16.mxu0 %v865_v1 }
  0xb4   :  { %868 = vmatpush3.bf16.msra.mxu0 %v867_v6 }
  0xb5   :  { %870 = vmatprep.subr.bf16.mxu0 %v869_v7 }
  0xb8   :  { %872 = vmatpush3.bf16.msra.mxu0 %v871_v10 }
  0xb9   :  { %874 = vmatprep.subr.bf16.mxu0 %v873_v13 }
  0xbc   :  { %876 = vmatpush3.bf16.msra.mxu0 %v875_v16 }
  0xbd   :  { %878 = vmatprep.subr.bf16.mxu0 %v877_v19  ;;  %v526_v19 = vld [vmem:[#allocation11 + $0x8] sm:$0xff] }
  0xbe   :  { %v881_v21 = vpack.c.bf16 %v528_v20, %v526_v19 }
  0xc0   :  { %880 = vmatpush3.bf16.msra.mxu0 %v879_v22  ;;  %882 = vmatprep.subr.bf16.mxu1 %v881_v21  ;;  %v525_v22 = vld [vmem:[#allocation11] sm:$0xff] }
  0xc1   :  { %v883_v24 = vpack.c.bf16 %v527_v23, %v525_v22 }
  0xc3   :  { %884 = vmatpush1.bf16.msra.mxu1 %v883_v24 }
  0xc4   :  { %886 = vmatprep.subr.bf16.mxu1 %v885_v29 }
 0x175   :  { %v276_v34 = vpop.f32.mrb[0].mxu0 }
 0x176   :  { %v277_v35 = vadd.f32 %v276_v34, %v193_v30  ;;  %v365_v36 = vpop.f32.mrb[0].mxu1  ;;  %v278_v37 = vpop.f32.mrb[1].mxu0 }
 0x177   :  { %v366_v38 = vadd.f32 %v365_v36, %v201_v31  ;;  %v279_v39 = vadd.f32 %v278_v37, %v197_v32  ;;  %v367_v40 = vpop.f32.mrb[1].mxu1 }
 0x178   :  { %v368_v41 = vadd.f32 %v367_v40, %v205_v33 }
 0x179   :  { %v1266_v42 = vsub.f32 %v277_v35, %v366_v38  ;;  %v282_v43 = vpop.f32.mrb[2].mxu0 }
 0x17a   :  { %v1268_v44 = vsub.f32 %v279_v39, %v368_v41  ;;  %v283_v45 = vadd.f32 %v282_v43, %v193_v30  ;;  %v371_v46 = vpop.f32.mrb[2].mxu1  ;;  %v284_v47 = vpop.f32.mrb[3].mxu0 }
 0x17b   :  { %v372_v48 = vadd.f32 %v371_v46, %v201_v31  ;;  %v285_v49 = vadd.f32 %v284_v47, %v197_v32  ;;  %v373_v50 = vpop.f32.mrb[3].mxu1  ;;  %v396_v53 = vmul.f32 %v1266_v42, %v1266_v42 }
 0x17c   :  { %v374_v51 = vadd.f32 %v373_v50, %v205_v33  ;;  %v397_v52 = vmul.f32 %v1268_v44, %v1268_v44 }
 0x17d   :  { %v1274_v54 = vsub.f32 %v283_v45, %v372_v48  ;;  %v288_v55 = vpop.f32.mrb[4].mxu0 }
 0x17e   :  { %v1276_v56 = vsub.f32 %v285_v49, %v374_v51  ;;  %v289_v57 = vadd.f32 %v288_v55, %v193_v30  ;;  %v377_v58 = vpop.f32.mrb[4].mxu1  ;;  %500 = vmatprep.mubr.f32.mxu0 %v397_v52  ;;  %v290_v59 = vpop.f32.mrb[5].mxu0 }
 0x17f   :  { %v378_v60 = vadd.f32 %v377_v58, %v201_v31  ;;  %v291_v61 = vadd.f32 %v290_v59, %v197_v32  ;;  %v379_v62 = vpop.f32.mrb[5].mxu1  ;;  %501 = vmatmul.mubr.f32.vlgmr.msra.gmra.mrb[8].mxu0 %v396_v53  ;;  %v398_v4 = vmul.f32 %v1274_v54, %v1274_v54  ;;  %v663_v58 = vld [vmem:[#allocation14] sm:$0x3] }
 0x180   :  { %v380_v63 = vadd.f32 %v379_v62, %v205_v33  ;;  %v399_v1 = vmul.f32 %v1276_v56, %v1276_v56 }
 0x181   :  { %v1280_v2 = vsub.f32 %v289_v57, %v378_v60  ;;  %v294_v3 = vpop.f32.mrb[6].mxu0  ;;  %v643_v57 = vld [vmem:[#allocation12] sm:$0x3] }
 0x182   :  { %v1284_v5 = vsub.f32 %v291_v61, %v380_v63  ;;  %v295_v6 = vadd.f32 %v294_v3, %v193_v30  ;;  %v383_v7 = vpop.f32.mrb[6].mxu1  ;;  %505 = vmatprep.mubr.f32.mxu0 %v399_v1  ;;  %v296_v8 = vpop.f32.mrb[7].mxu0  ;;  %v529_v30 = vld [vmem:[#allocation11 + $0x20] sm:$0xff]  ;;  %v648_v59 = vrot.slane %v643_v57, %v1260_v25  ;;  %v652_v61 = vrot.slane %v643_v57, %v1262_v28 }
 0x183   :  { %v384_v9 = vadd.f32 %v383_v7, %v201_v31  ;;  %v297_v10 = vadd.f32 %v296_v8, %v197_v32  ;;  %v385_v11 = vpop.f32.mrb[7].mxu1  ;;  %506 = vmatmul.mubr.f32.gmra.mrb[10].mxu0 %v398_v4  ;;  %v400_v15 = vmul.f32 %v1280_v2, %v1280_v2  ;;  %v531_v31 = vld [vmem:[#allocation11 + $0x30] sm:$0xff]  ;;  %v668_v63 = vrot.slane %v663_v58, %v1260_v25 }
 0x184   :  { %v386_v12 = vadd.f32 %v385_v11, %v205_v33  ;;  %v401_v13 = vmul.f32 %v1284_v5, %v1284_v5  ;;  %v887_v32 = vpack.c.bf16 %v531_v31, %v529_v30  ;;  %v672_v4 = vrot.slane %v663_v58, %v1262_v28 }
 0x185   :  { %v1288_v14 = vsub.f32 %v295_v6, %v384_v9 }
 0x186   :  { %v1292_v16 = vsub.f32 %v297_v10, %v386_v12  ;;  %510 = vmatprep.mubr.f32.mxu0 %v401_v13  ;;  %888 = vmatpush1.bf16.msra.mxu1 %v887_v32 }
 0x187   :  { %511 = vmatmul.mubr.f32.gmra.mrb[12].mxu0 %v400_v15  ;;  %v402_v18 = vmul.f32 %v1288_v14, %v1288_v14 }
 0x188   :  { %v403_v17 = vmul.f32 %v1292_v16, %v1292_v16 }
 0x18a   :  { %515 = vmatprep.mubr.f32.mxu0 %v403_v17 }
 0x18b   :  { %516 = vmatmul.mubr.f32.gmra.mrb[14].mxu0 %v402_v18 }
 0x252   :  { %v773_v33 = vpop.f32.mrb[8].mxu0 }
 0x253   :  { %v774_v34 = vpop.f32.mrb[9].mxu0 }
 0x254   :  { %v775_v35 = vadd.f32 %v774_v34, %v773_v33 }
 0x256   :  { %v503_v36 = vadd.f32 1e-05, %v775_v35  ;;  %v776_v37 = vpop.f32.mrb[10].mxu0 }
 0x257   :  { %v777_v38 = vpop.f32.mrb[11].mxu0 }
 0x258   :  { %904 = vrsqrt.f32 %v503_v36  ;;  %v778_v39 = vadd.f32 %v777_v38, %v776_v37 }
 0x25a   :  { %v508_v40 = vadd.f32 1e-05, %v778_v39  ;;  %v779_v41 = vpop.f32.mrb[12].mxu0 }
 0x25b   :  { %v780_v43 = vpop.f32.mrb[13].mxu0 }
 0x25c   :  { %906 = vrsqrt.f32 %v508_v40  ;;  %v781_v45 = vadd.f32 %v780_v43, %v779_v41 }
 0x25e   :  { %v513_v46 = vadd.f32 1e-05, %v781_v45  ;;  %v782_v47 = vpop.f32.mrb[14].mxu0 }
 0x25f   :  { %v783_v48 = vpop.f32.mrb[15].mxu0 }
 0x260   :  { %908 = vrsqrt.f32 %v513_v46  ;;  %v784_v49 = vadd.f32 %v783_v48, %v782_v47 }
 0x262   :  { %v905_v50 = vpop.eup %904  ;;  %v518_v51 = vadd.f32 1e-05, %v784_v49 }
 0x263   :  { %737 = vmatmul.mubr.msk.f32.vlgmr.msra.gmra.mrb[8].mxu1 %vm533_vm0, %v905_v50 }
 0x264   :  { %910 = vrsqrt.f32 %v518_v51  ;;  %616 = vmatprep.mubr.f32.mxu1 %v1111_v0 }
 0x266   :  { %v907_v52 = vpop.eup %906 }
 0x267   :  { %738 = vmatmul.mubr.msk.f32.gmra.mrb[10].mxu1 %vm533_vm0, %v907_v52 }
 0x268   :  { %622 = vmatprep.mubr.f32.mxu1 %v1111_v0 }
 0x26a   :  { %v909_v53 = vpop.eup %908 }
 0x26b   :  { %739 = vmatmul.mubr.msk.f32.gmra.mrb[12].mxu1 %vm533_vm0, %v909_v53 }
 0x26c   :  { %628 = vmatprep.mubr.f32.mxu1 %v1111_v0  ;;  %v692_v0 = vstv %s1338_s7  ;;  %s1112_s7 = smov [#allocation15]  }
 0x26d   :  { %s722_s28 = sshll.u32 %s1112_s7, 4  ;;  %s723_s28 = int_to_ptr.vmem [resolvable:$true] %s722_s28 }
 0x26e   :  { %v911_v55 = vpop.eup %910  ;;  %s1066_s9 = scalar_lea.vmem %s723_s28, 1024  ;;  %p1071_p1 = scmp.lt.s32.totalorder %s723_s28, %s723_s28 }
 0x26f   :  { %740 = vmatmul.mubr.msk.f32.gmra.mrb[14].mxu1 %vm533_vm0, %v911_v55  ;;  %p1067_p0 = scmp.ne.s32.totalorder %s723_s28, %s1066_s9  ;;  %p1072_p2 = scmp.lt.s32.totalorder %s1066_s9, %s1066_s9 }
 0x271   :  { %p1073_p3 = por %p1072_p2, %p1071_p1 }
 0x273   :  { %p1074_p4 = pnand %p1073_p3, %p1067_p0 }
 0x336   :  { %v612_v60 = vpop.f32.mrb[8].mxu1 }
 0x337   :  { %v635_v62 = vmul.f32 %v612_v60, %v1266_v42  ;;  %v614_v1 = vpop.f32.mrb[9].mxu1 }
 0x338   :  { %v636_v3 = vmul.f32 %v614_v1, %v1268_v44 }
 0x339   :  { %v655_v6 = vmul.f32 %v648_v59, %v635_v62 }
 0x33a   :  { %v656_v7 = vmul.f32 %v652_v61, %v636_v3  ;;  %v618_v8 = vpop.f32.mrb[10].mxu1 }
 0x33b   :  { %v675_v9 = vadd.f32 %v668_v63, %v655_v6  ;;  %v637_v10 = vmul.f32 %v618_v8, %v1274_v54  ;;  %v620_v11 = vpop.f32.mrb[11].mxu1 }
 0x33c   :  { %v676_v12 = vadd.f32 %v672_v4, %v656_v7  ;;  %v638_v42 = vmul.f32 %v620_v11, %v1276_v56 }
 0x33d   :  { %vm684_vm1 = vcmp.ge.f32.partialorder %v675_v9, 0.0  ;;  %v693_v25 = vmul.f32 %v692_v0, %v675_v9  ;;  %v657_v13 = vmul.f32 %v648_v59, %v637_v10 }
 0x33e   :  { %vm685_vm2 = vcmp.ge.f32.partialorder %v676_v12, 0.0  ;;  %v694_v44 = vmul.f32 %v692_v0, %v676_v12  ;;  %v658_v28 = vmul.f32 %v652_v61, %v638_v42  ;;  %v624_v15 = vpop.f32.mrb[12].mxu1 }
 0x33f   :  { %v701_v17 = vsel %vm684_vm1, %v675_v9, %v693_v25  ;;  %v677_v18 = vadd.f32 %v668_v63, %v657_v13  ;;  %v639_v19 = vmul.f32 %v624_v15, %v1280_v2  ;;  %v626_v20 = vpop.f32.mrb[13].mxu1 }
 0x340   :  { %709 = vst [vmem:[#allocation15] sm:$0xff] %v701_v17  ;;  %v702_v21 = vsel %vm685_vm2, %v676_v12, %v694_v44  ;;  %v678_v22 = vadd.f32 %v672_v4, %v658_v28  ;;  %v640_v54 = vmul.f32 %v626_v20, %v1284_v5 }
 0x341   :  { %710 = vst [vmem:[#allocation15 + $0x8] sm:$0xff] %v702_v21  ;;  %vm686_vm3 = vcmp.ge.f32.partialorder %v677_v18, 0.0  ;;  %v695_v56 = vmul.f32 %v692_v0, %v677_v18  ;;  %v659_v23 = vmul.f32 %v648_v59, %v639_v19 }
 0x342   :  { %vm687_vm4 = vcmp.ge.f32.partialorder %v678_v22, 0.0  ;;  %v696_v24 = vmul.f32 %v692_v0, %v678_v22  ;;  %v660_v26 = vmul.f32 %v652_v61, %v640_v54  ;;  %v630_v27 = vpop.f32.mrb[14].mxu1 }
 0x343   :  { %v703_v29 = vsel %vm686_vm3, %v677_v18, %v695_v56  ;;  %v679_v30 = vadd.f32 %v668_v63, %v659_v23  ;;  %v641_v31 = vmul.f32 %v630_v27, %v1288_v14  ;;  %v632_v32 = vpop.f32.mrb[15].mxu1 }
 0x344   :  { %711 = vst [vmem:[#allocation15 + $0x10] sm:$0xff] %v703_v29  ;;  %v704_v2 = vsel %vm687_vm4, %v678_v22, %v696_v24  ;;  %v680_v33 = vadd.f32 %v672_v4, %v660_v26  ;;  %v642_v34 = vmul.f32 %v632_v32, %v1292_v16 }
 0x345   :  { %712 = vst [vmem:[#allocation15 + $0x18] sm:$0xff] %v704_v2  ;;  %vm688_vm5 = vcmp.ge.f32.partialorder %v679_v30, 0.0  ;;  %v697_v5 = vmul.f32 %v692_v0, %v679_v30  ;;  %v661_v35 = vmul.f32 %v648_v59, %v641_v31 }
 0x346   :  { %vm689_vm6 = vcmp.ge.f32.partialorder %v680_v33, 0.0  ;;  %v698_v36 = vmul.f32 %v692_v0, %v680_v33  ;;  %v662_v37 = vmul.f32 %v652_v61, %v642_v34 }
 0x347   :  { %v705_v38 = vsel %vm688_vm5, %v679_v30, %v697_v5  ;;  %v681_v39 = vadd.f32 %v668_v63, %v661_v35 }
 0x348   :  { %713 = vst [vmem:[#allocation15 + $0x20] sm:$0xff] %v705_v38  ;;  %v706_v40 = vsel %vm689_vm6, %v680_v33, %v698_v36  ;;  %v682_v41 = vadd.f32 %v672_v4, %v662_v37 }
 0x349   :  { %714 = vst [vmem:[#allocation15 + $0x28] sm:$0xff] %v706_v40  ;;  %vm690_vm7 = vcmp.ge.f32.partialorder %v681_v39, 0.0  ;;  %v699_v14 = vmul.f32 %v692_v0, %v681_v39 }
 0x34a   :  { %vm691_vm8 = vcmp.ge.f32.partialorder %v682_v41, 0.0  ;;  %v700_v43 = vmul.f32 %v692_v0, %v682_v41 }
 0x34b   :  { %v707_v16 = vsel %vm690_vm7, %v681_v39, %v699_v14 }
 0x34c   :  { %715 = vst [vmem:[#allocation15 + $0x30] sm:$0xff] %v707_v16  ;;  %v708_v45 = vsel %vm691_vm8, %v682_v41, %v700_v43 }
 0x34d   :  { %716 = vst [vmem:[#allocation15 + $0x38] sm:$0xff] %v708_v45 }
 0x34e   :  { %1077 = shalt.err (!%p1074_p4)
}
 0x34f   :  { %s1078_s23 = scalar_lea.hbm %s1339_s8, 1024 }
 0x350   :  { %p1079_p5 = scmp.ne.s32.totalorder %s1339_s8, %s1078_s23  ;;  %p1082_p6 = scmp.lt.u32.totalorder %s1078_s23, %s1339_s8 }
 0x352   :  { %p1084_p7 = pnand %p1082_p6, %p1079_p5 }
 0x354   :  { %1087 = shalt.err (!%p1084_p7)
}
 0x355   :  { %728 = dma.vmem_to_hbm [thread:$0]  %s723_s28, 1024, %s1339_s8, [#allocation5], %s1108_s2, %s1108_s2, %s1109_s25  }
 0x356   :  { %1096 = dma.done.wait [#allocation5], 1024  }
 0x357   :  { %1097 = vsyncadd [#allocation5], 4294966272 }
 0x358   :  { %732 = vsyncpa [#allocation4], 1 }
 0x359   :  { %733 = vsyncpa [#allocation7], 1 }
 0x35a   :  { %734 = vsyncpa [#allocation10], 1 }
 0x35b   :  { %735 = vsyncpa [#allocation13], 1 }
 0x35c   :  { %736 = vsyncpa [#allocation5], 1 }

</bundles_post_ra>
